<compile_context>
chip_gen: v5e
topology: v5e:2x2
jax: 0.10.0
libtpu: 0.0.40
codegen_flags: <defaults>
</compile_context>

<pallas_src>
import functools

import jax
import jax.numpy as jnp
from jax.experimental import pallas as pl
from jax.experimental.pallas import tpu as pltpu

HIDDEN = 30              # logical hidden width from the PyTorch module (nn.Linear(s_dim, 30))
H_PAD = 128              # padded hidden width (lane-aligned for the MXU)
A_PAD = 128              # padded action width used for in-VMEM compute only
MAX_SINGLE_STEP = 1024   # run the whole batch as one grid step up to this size
TB_LARGE = 512           # tile for larger batches (keeps >=2 parallel steps -> both v7x TCs)


def actor_kernel(x_ref, w1_ref, w2_ref, consts_ref, o_ref, *, a_dim):
    # consts is one packed row: [ b1 (H_PAD) | b2 (A_PAD) | a_bound (A_PAD) ]
    b1 = consts_ref[:, 0:H_PAD]                                  # [1, H_PAD]
    b2 = consts_ref[:, H_PAD:H_PAD + A_PAD]                      # [1, A_PAD]
    bound = consts_ref[:, H_PAD + A_PAD:H_PAD + 2 * A_PAD]       # [1, A_PAD]

    x = x_ref[...]                                               # [tb, S]
    h = jnp.dot(x, w1_ref[...], preferred_element_type=jnp.float32) + b1
    h = jnp.maximum(h, 0.0)                                      # ReLU (VPU)
    y = jnp.dot(h, w2_ref[...], preferred_element_type=jnp.float32) + b2
    act = jnp.tanh(y) * bound                                    # tanh (EUP) * a_bound
    # Store only the real action columns: ~32x less output HBM traffic than a
    # 128-lane padded slab; masked vst lands in a store slot with ample slack.
    o_ref[...] = act[:, :a_dim]


def actor_forward(x, w1p, w2p, consts, a_dim):
    """x: [B, s_dim] f32 -> [B, a_dim] f32 (padded weights/consts from pad_actor_params)."""
    B, S = x.shape

    # Tile selection (review): amortize per-grid-step overhead with the largest
    # sensible tile -- whole batch in one step for small B, 512-row tiles for
    # large B so >= 2 "parallel" steps feed both v7x TensorCores.
    tb = B if B <= MAX_SINGLE_STEP else TB_LARGE
    grid = (pl.cdiv(B, tb),)

    cost = pl.CostEstimate(
        flops=2 * B * (S * H_PAD + H_PAD * A_PAD),
        transcendentals=B * A_PAD,
        bytes_accessed=4 * (x.size + w1p.size + w2p.size + consts.size + B * a_dim),
    )

    out = pl.pallas_call(
        functools.partial(actor_kernel, a_dim=a_dim),
        out_shape=jax.ShapeDtypeStruct((B, a_dim), jnp.float32),
        grid_spec=pltpu.PrefetchScalarGridSpec(
            num_scalar_prefetch=0,
            grid=grid,
            in_specs=[
                pl.BlockSpec((tb, S), lambda i: (i, 0)),                  # x tile (pipelined)
                pl.BlockSpec((S, H_PAD), lambda i: (0, 0)),               # W1 (VMEM-resident)
                pl.BlockSpec((H_PAD, A_PAD), lambda i: (0, 0)),           # W2 (VMEM-resident)
                pl.BlockSpec((1, H_PAD + 2 * A_PAD), lambda i: (0, 0)),   # packed b1|b2|bound
            ],
            out_specs=pl.BlockSpec((tb, a_dim), lambda i: (i, 0)),        # narrow real-width output
        ),
        compiler_params=pltpu.CompilerParams(
            dimension_semantics=("parallel",)),
        cost_estimate=cost,
    )(x, w1p, w2p, consts)

    return out


def init_actor_params(key, s_dim, a_dim, hidden=HIDDEN):
    """Deterministic init mimicking nn.Linear default (U[-1/sqrt(fan_in), +])."""
    k1, k2, k3, k4 = jax.random.split(key, 4)
    lim1 = 1.0 / jnp.sqrt(jnp.float32(s_dim))
    lim2 = 1.0 / jnp.sqrt(jnp.float32(hidden))
    w1 = jax.random.uniform(k1, (s_dim, hidden), jnp.float32, -lim1, lim1)
    b1 = jax.random.uniform(k2, (1, hidden), jnp.float32, -lim1, lim1)
    w2 = jax.random.uniform(k3, (hidden, a_dim), jnp.float32, -lim2, lim2)
    b2 = jax.random.uniform(k4, (1, a_dim), jnp.float32, -lim2, lim2)
    return w1, b1, w2, b2


def pad_actor_params(w1, b1, w2, b2, a_bound):
    """One-time zero-padding of feature axes + packing of the broadcast row.

    Padded hidden units have zero incoming weight & bias -> relu(0)=0 and zero
    outgoing W2 rows, so they contribute nothing; padded action columns are
    never stored (kernel writes only the first a_dim columns).
    """
    s_dim, hidden = w1.shape
    a_dim = w2.shape[1]
    w1p = jnp.zeros((s_dim, H_PAD), jnp.float32).at[:, :hidden].set(w1)
    w2p = jnp.zeros((H_PAD, A_PAD), jnp.float32).at[:hidden, :a_dim].set(w2)
    b1p = jnp.zeros((1, H_PAD), jnp.float32).at[:, :hidden].set(b1)
    b2p = jnp.zeros((1, A_PAD), jnp.float32).at[:, :a_dim].set(b2)
    bdp = jnp.zeros((1, A_PAD), jnp.float32).at[:, :a_dim].set(a_bound)
    consts = jnp.concatenate([b1p, b2p, bdp], axis=1)   # [1, H_PAD + 2*A_PAD]
    return w1p, w2p, consts


if __name__ == "__main__":
    # Shapes implied by the module: obs dim, hidden=30, action dim.
    B, S_DIM, A_DIM = 256, 16, 4

    key = jax.random.PRNGKey(0)
    kx, kp = jax.random.split(key)
    x = jax.random.normal(kx, (B, S_DIM), jnp.float32)
    w1, b1, w2, b2 = init_actor_params(kp, S_DIM, A_DIM)
    a_bound = jnp.full((1, A_DIM), 2.0, jnp.float32)   # e.g. env.action_space.high

    w1p, w2p, consts = pad_actor_params(w1, b1, w2, b2, a_bound)

    out = actor_forward(x, w1p, w2p, consts, A_DIM)
    out = jax.block_until_ready(out)

    # Pure-JAX reference check (non-kernel glue, just validation).
    ref = jnp.tanh(jnp.maximum(x @ w1 + b1, 0.0) @ w2 + b2) * a_bound
    assert out.shape == (B, A_DIM)
    assert jnp.allclose(out, ref, atol=1e-5), "mismatch vs reference"

    print("KERNEL_OK")
</pallas_src>

<mosaic_0001>
module attributes {stable_mosaic.version = 11 : i64} {
  func.func @actor_kernel(%arg0: i32, %arg1: memref<256x16xf32, #tpu.memory_space<vmem>>, %arg2: memref<16x128xf32, #tpu.memory_space<vmem>>, %arg3: memref<128x128xf32, #tpu.memory_space<vmem>>, %arg4: memref<1x384xf32, #tpu.memory_space<vmem>>, %arg5: memref<256x4xf32, #tpu.memory_space<vmem>>) attributes {dimension_semantics = [#tpu.dimension_semantics<parallel>], iteration_bounds = array<i64: 1>, scalar_prefetch = 0 : i64, scratch_operands = 0 : i64, tpu.core_type = #tpu.core_type<tc>, window_params = [{transform_indices = @transform_0, window_bounds = array<i64: 256, 16>}, {pipeline_mode = #tpu.pipeline_mode<synchronous>, transform_indices = @transform_1, window_bounds = array<i64: 16, 128>}, {pipeline_mode = #tpu.pipeline_mode<synchronous>, transform_indices = @transform_2, window_bounds = array<i64: 128, 128>}, {pipeline_mode = #tpu.pipeline_mode<synchronous>, transform_indices = @transform_3, window_bounds = array<i64: 1, 384>}, {transform_indices = @transform_4, window_bounds = array<i64: 256, 4>}]} {
    %c0 = arith.constant 0 : index
    %c0_0 = arith.constant 0 : index
    %0 = vector.load %arg4[%c0, %c0_0] : memref<1x384xf32, #tpu.memory_space<vmem>>, vector<1x128xf32>
    %c0_1 = arith.constant 0 : index
    %c128 = arith.constant 128 : index
    %1 = vector.load %arg4[%c0_1, %c128] : memref<1x384xf32, #tpu.memory_space<vmem>>, vector<1x128xf32>
    %c0_2 = arith.constant 0 : index
    %c256 = arith.constant 256 : index
    %2 = vector.load %arg4[%c0_2, %c256] : memref<1x384xf32, #tpu.memory_space<vmem>>, vector<1x128xf32>
    %c0_3 = arith.constant 0 : index
    %c0_4 = arith.constant 0 : index
    %3 = vector.load %arg1[%c0_3, %c0_4] : memref<256x16xf32, #tpu.memory_space<vmem>>, vector<256x16xf32>
    %c0_5 = arith.constant 0 : index
    %c0_6 = arith.constant 0 : index
    %4 = vector.load %arg2[%c0_5, %c0_6] : memref<16x128xf32, #tpu.memory_space<vmem>>, vector<16x128xf32>
    %cst = arith.constant dense<0.000000e+00> : vector<256x128xf32>
    %5 = tpu.matmul %3, %4, %cst {dimension_numbers = #tpu.dot_dimension_numbers<[1], [0], [0], [1], [0, 0, 1, 1], [], []>} : vector<256x16xf32>, vector<16x128xf32>, vector<256x128xf32> -> vector<256x128xf32>
    %6 = vector.broadcast %0 : vector<1x128xf32> to vector<256x128xf32>
    %7 = arith.addf %5, %6 : vector<256x128xf32>
    %cst_7 = arith.constant 0.000000e+00 : f32
    %8 = vector.broadcast %cst_7 : f32 to vector<256x128xf32>
    %9 = arith.maximumf %7, %8 : vector<256x128xf32>
    %c0_8 = arith.constant 0 : index
    %c0_9 = arith.constant 0 : index
    %10 = vector.load %arg3[%c0_8, %c0_9] : memref<128x128xf32, #tpu.memory_space<vmem>>, vector<128x128xf32>
    %cst_10 = arith.constant dense<0.000000e+00> : vector<256x128xf32>
    %11 = tpu.matmul %9, %10, %cst_10 {dimension_numbers = #tpu.dot_dimension_numbers<[1], [0], [0], [1], [0, 0, 1, 1], [], []>} : vector<256x128xf32>, vector<128x128xf32>, vector<256x128xf32> -> vector<256x128xf32>
    %12 = vector.broadcast %1 : vector<1x128xf32> to vector<256x128xf32>
    %13 = arith.addf %11, %12 : vector<256x128xf32>
    %14 = math.tanh %13 : vector<256x128xf32>
    %15 = vector.broadcast %2 : vector<1x128xf32> to vector<256x128xf32>
    %16 = arith.mulf %14, %15 : vector<256x128xf32>
    %17 = vector.extract_strided_slice %16 {offsets = [0, 0], sizes = [256, 4], strides = [1, 1]} : vector<256x128xf32> to vector<256x4xf32>
    %c0_11 = arith.constant 0 : index
    %c0_12 = arith.constant 0 : index
    %18 = vector.load %arg5[%c0_11, %c0_12] : memref<256x4xf32, #tpu.memory_space<vmem>>, vector<256x4xf32>
    tpu.vector_store %arg5[%c0_11, %c0_12], %17 {strides = array<i32>} : memref<256x4xf32, #tpu.memory_space<vmem>>, vector<256x4xf32>,
    return
  }
  func.func @transform_0(%arg0: i32) -> (i32, i32) {
    %c0_i32 = arith.constant 0 : i32
    %c0_i32_0 = arith.constant 0 : i32
    return %arg0, %c0_i32 : i32, i32
  }
  func.func @transform_1(%arg0: i32) -> (i32, i32) {
    %c0_i32 = arith.constant 0 : i32
    %c0_i32_0 = arith.constant 0 : i32
    %c0_i32_1 = arith.constant 0 : i32
    return %c0_i32, %c0_i32_0 : i32, i32
  }
  func.func @transform_2(%arg0: i32) -> (i32, i32) {
    %c0_i32 = arith.constant 0 : i32
    %c0_i32_0 = arith.constant 0 : i32
    %c0_i32_1 = arith.constant 0 : i32
    return %c0_i32, %c0_i32_0 : i32, i32
  }
  func.func @transform_3(%arg0: i32) -> (i32, i32) {
    %c0_i32 = arith.constant 0 : i32
    %c0_i32_0 = arith.constant 0 : i32
    %c0_i32_1 = arith.constant 0 : i32
    return %c0_i32, %c0_i32_0 : i32, i32
  }
  func.func @transform_4(%arg0: i32) -> (i32, i32) {
    %c0_i32 = arith.constant 0 : i32
    %c0_i32_0 = arith.constant 0 : i32
    return %arg0, %c0_i32 : i32, i32
  }
}

</mosaic_0001>

<bundles_post_ra>
// kernel: tpu_custom_call.1
= control target key start
LH: loop header
LB: loop body
LE: loop exit
PB: predicated region body
PF: predicated region fallthrough
CT: control target
= control target key end

     0   :  { %vm57_vm0 = vcmask 130048   ;;  %vm498_vm1 = vcmask 31744   ;;  %s1123_s1 = inlined_call_operand.vmem [shape: f32[16,128], index: 1, kind: input, shape index: {}]   ;;  %s1124_s0 = inlined_call_operand.vmem [shape: f32[256,16], index: 0, kind: input, shape index: {}]   ;;  %s1125_s3 = inlined_call_operand.vmem [shape: f32[1,384], index: 3, kind: input, shape index: {}]   ;;  %s1126_s2 = inlined_call_operand.vmem [shape: f32[128,128], index: 2, kind: input, shape index: {}]   ;;  %s1127_s4 = inlined_call_operand.vmem [shape: f32[256,4], index: 4, kind: output, shape index: {}]  }
   0x1   :  { %v53_v0 = vld [vmem:[%s1123_s1 + $0x8] sm:$0xff]  ;;  %v52_v1 = vld [vmem:[%s1123_s1] sm:$0xff]  ;;  %v22_v4 = vld [vmem:[%s1124_s0 + $0x10] sm:$0xff] }
   0x2   :  { %168 = vmatpush.msra.mxu0 %v53_v0  ;;  %v20_v2 = vld [vmem:[%s1124_s0] sm:$0xff]  ;;  %567 = vmatpush.msra.mxu3 %v53_v0  ;;  %v21_v3 = vld [vmem:[%s1124_s0 + $0x8] sm:$0xff]  ;;  %v23_v5 = vld [vmem:[%s1124_s0 + $0x18] sm:$0xff] }
   0x3   :  { %v24_v6 = vld [vmem:[%s1124_s0 + $0x20] sm:$0xff]  ;;  %v25_v7 = vld [vmem:[%s1124_s0 + $0x28] sm:$0xff]  ;;  %v26_v8 = vld [vmem:[%s1124_s0 + $0x30] sm:$0xff] }
   0x4   :  { %169 = vmatpush.msra.mxu0 %v52_v1  ;;  %568 = vmatpush.msra.mxu3 %v52_v1  ;;  %v27_v9 = vld [vmem:[%s1124_s0 + $0x38] sm:$0xff]  ;;  %v28_v10 = vld [vmem:[%s1124_s0 + $0x40] sm:$0xff]  ;;  %v313_v12 = vld [vmem:[%s1126_s2 + $0x70] sm:$0xff] }
   0x5   :  { %535 = vmatmul.msk.f32.vlgmr.msra.gmra.mxu0 %vm57_vm0, %v20_v2  ;;  %v314_v11 = vld [vmem:[%s1126_s2 + $0x78] sm:$0xff]  ;;  %v312_v13 = vld [vmem:[%s1126_s2 + $0x68] sm:$0xff]  ;;  %v311_v15 = vld [vmem:[%s1126_s2 + $0x60] sm:$0xff] }
   0x6   :  { %318 = vmatpush.msra.mxu1 %v314_v11  ;;  %569 = vmatpush.msra.mxu2 %v314_v11  ;;  %v29_v14 = vld [vmem:[%s1124_s0 + $0x48] sm:$0xff]  ;;  %v310_v16 = vld [vmem:[%s1126_s2 + $0x58] sm:$0xff]  ;;  %v309_v17 = vld [vmem:[%s1126_s2 + $0x50] sm:$0xff] }
   0x7   :  { %570 = vmatpush.msrb.mxu3 %v314_v11  ;;  %v308_v18 = vld [vmem:[%s1126_s2 + $0x48] sm:$0xff]  ;;  %v30_v19 = vld [vmem:[%s1124_s0 + $0x50] sm:$0xff]  ;;  %v307_v20 = vld [vmem:[%s1126_s2 + $0x40] sm:$0xff] }
   0x8   :  { %319 = vmatpush.msra.mxu1 %v313_v12  ;;  %571 = vmatpush.msra.mxu2 %v313_v12  ;;  %v306_v21 = vld [vmem:[%s1126_s2 + $0x38] sm:$0xff]  ;;  %v305_v22 = vld [vmem:[%s1126_s2 + $0x30] sm:$0xff]  ;;  %v304_v23 = vld [vmem:[%s1126_s2 + $0x28] sm:$0xff] }
   0x9   :  { %572 = vmatpush.msrb.mxu3 %v313_v12  ;;  %v31_v24 = vld [vmem:[%s1124_s0 + $0x58] sm:$0xff]  ;;  %v303_v25 = vld [vmem:[%s1126_s2 + $0x20] sm:$0xff]  ;;  %v38_v26 = vld [vmem:[%s1124_s0 + $0x90] sm:$0xff] }
   0xa   :  { %320 = vmatpush.msra.mxu1 %v312_v13  ;;  %573 = vmatpush.msra.mxu2 %v312_v13  ;;  %v302_v27 = vld [vmem:[%s1126_s2 + $0x18] sm:$0xff]  ;;  %v301_v28 = vld [vmem:[%s1126_s2 + $0x10] sm:$0xff]  ;;  %v32_v29 = vld [vmem:[%s1124_s0 + $0x60] sm:$0xff] }
   0xb   :  { %574 = vmatpush.msrb.mxu3 %v312_v13  ;;  %v300_v30 = vld [vmem:[%s1126_s2 + $0x8] sm:$0xff]  ;;  %v299_v31 = vld [vmem:[%s1126_s2] sm:$0xff]  ;;  %v39_v32 = vld [vmem:[%s1124_s0 + $0x98] sm:$0xff] }
   0xc   :  { %321 = vmatpush.msra.mxu1 %v311_v15  ;;  %575 = vmatpush.msra.mxu2 %v311_v15  ;;  %v33_v33 = vld [vmem:[%s1124_s0 + $0x68] sm:$0xff]  ;;  %v40_v34 = vld [vmem:[%s1124_s0 + $0xa0] sm:$0xff]  ;;  %v34_v35 = vld [vmem:[%s1124_s0 + $0x70] sm:$0xff] }
   0xd   :  { %536 = vmatmul.msk.f32.gmra.mxu0 %vm57_vm0, %v21_v3  ;;  %576 = vmatpush.msrb.mxu3 %v311_v15  ;;  %v41_v36 = vld [vmem:[%s1124_s0 + $0xa8] sm:$0xff]  ;;  %v35_v37 = vld [vmem:[%s1124_s0 + $0x78] sm:$0xff]  ;;  %v42_v38 = vld [vmem:[%s1124_s0 + $0xb0] sm:$0xff] }
   0xe   :  { %322 = vmatpush.msra.mxu1 %v310_v16  ;;  %577 = vmatpush.msra.mxu2 %v310_v16  ;;  %v834_v39 = vld [vmem:[%s1125_s3] ss:$0 sm:$0xff]  ;;  %v43_v44 = vld [vmem:[%s1124_s0 + $0xb8] sm:$0xff]  ;;  %v37_v46 = vld [vmem:[%s1124_s0 + $0x88] sm:$0xff] }
   0xf   :  { %578 = vmatpush.msrb.mxu3 %v310_v16  ;;  %v36_v41 = vld [vmem:[%s1124_s0 + $0x80] sm:$0xff]  ;;  %v45_v53 = vld [vmem:[%s1124_s0 + $0xc8] sm:$0xff]  ;;  %v46_v57 = vld [vmem:[%s1124_s0 + $0xd0] sm:$0xff] }
  0x10   :  { %323 = vmatpush.msra.mxu1 %v309_v17  ;;  %579 = vmatpush.msra.mxu2 %v309_v17  ;;  %v44_v49 = vld [vmem:[%s1124_s0 + $0xc0] sm:$0xff]  ;;  %v47_v61 = vld [vmem:[%s1124_s0 + $0xd8] sm:$0xff] }
  0x11   :  { %580 = vmatpush.msrb.mxu3 %v309_v17  ;;  %v48_v1 = vld [vmem:[%s1124_s0 + $0xe0] sm:$0xff]  ;;  %v51_v13 = vld [vmem:[%s1124_s0 + $0xf8] sm:$0xff] }
  0x12   :  { %324 = vmatpush.msra.mxu1 %v308_v18  ;;  %581 = vmatpush.msra.mxu2 %v308_v18 }
  0x13   :  { %582 = vmatpush.msrb.mxu3 %v308_v18 }
  0x14   :  { %325 = vmatpush.msra.mxu1 %v307_v20  ;;  %583 = vmatpush.msra.mxu2 %v307_v20 }
  0x15   :  { %537 = vmatmul.msk.f32.gmra.mxu0 %vm57_vm0, %v22_v4  ;;  %584 = vmatpush.msrb.mxu3 %v307_v20 }
  0x16   :  { %326 = vmatpush.msra.mxu1 %v306_v21  ;;  %585 = vmatpush.msra.mxu2 %v306_v21 }
  0x17   :  { %586 = vmatpush.msrb.mxu3 %v306_v21 }
  0x18   :  { %327 = vmatpush.msra.mxu1 %v305_v22  ;;  %587 = vmatpush.msra.mxu2 %v305_v22 }
  0x19   :  { %588 = vmatpush.msrb.mxu3 %v305_v22 }
  0x1a   :  { %328 = vmatpush.msra.mxu1 %v304_v23  ;;  %589 = vmatpush.msra.mxu2 %v304_v23 }
  0x1b   :  { %590 = vmatpush.msrb.mxu3 %v304_v23 }
  0x1c   :  { %329 = vmatpush.msra.mxu1 %v303_v25  ;;  %553 = vmatmul.msk.f32.vlgmr.msra.gmra.mxu3 %vm57_vm0, %v38_v26 }
  0x1d   :  { %538 = vmatmul.msk.f32.gmra.mxu0 %vm57_vm0, %v23_v5  ;;  %591 = vmatpush.msra.mxu2 %v303_v25  ;;  %v49_v5 = vld [vmem:[%s1124_s0 + $0xe8] sm:$0xff] }
  0x1e   :  { %592 = vmatpush.msrb.mxu3 %v303_v25  ;;  %330 = vmatpush.msra.mxu1 %v302_v27 }
  0x1f   :  { %593 = vmatpush.msra.mxu2 %v302_v27 }
  0x20   :  { %594 = vmatpush.msrb.mxu3 %v302_v27  ;;  %331 = vmatpush.msra.mxu1 %v301_v28 }
  0x21   :  { %595 = vmatpush.msra.mxu2 %v301_v28 }
  0x22   :  { %596 = vmatpush.msrb.mxu3 %v301_v28  ;;  %332 = vmatpush.msra.mxu1 %v300_v30 }
  0x23   :  { %597 = vmatpush.msra.mxu2 %v300_v30 }
  0x24   :  { %333 = vmatpush.msra.mxu1 %v299_v31  ;;  %554 = vmatmul.msk.f32.gmra.mxu3 %vm57_vm0, %v39_v32 }
  0x25   :  { %539 = vmatmul.msk.f32.gmra.mxu0 %vm57_vm0, %v24_v6  ;;  %599 = vmatpush.msra.mxu2 %v299_v31 }
  0x26   :  { %598 = vmatpush.msrb.mxu3 %v300_v30 }
  0x28   :  { %600 = vmatpush.msrb.mxu3 %v299_v31 }
  0x2c   :  { %555 = vmatmul.msk.f32.gmra.mxu3 %vm57_vm0, %v40_v34 }
  0x2d   :  { %540 = vmatmul.msk.f32.gmra.mxu0 %vm57_vm0, %v25_v7 }
  0x34   :  { %556 = vmatmul.msk.f32.gmra.mxu3 %vm57_vm0, %v41_v36 }
  0x35   :  { %541 = vmatmul.msk.f32.gmra.mxu0 %vm57_vm0, %v26_v8 }
  0x3c   :  { %557 = vmatmul.msk.f32.gmra.mxu3 %vm57_vm0, %v42_v38 }
  0x3d   :  { %542 = vmatmul.msk.f32.gmra.mxu0 %vm57_vm0, %v27_v9  ;;  %v50_v9 = vld [vmem:[%s1124_s0 + $0xf0] sm:$0xff] }
  0x44   :  { %558 = vmatmul.msk.f32.gmra.mxu3 %vm57_vm0, %v43_v44 }
  0x45   :  { %543 = vmatmul.msk.f32.gmra.mxu0 %vm57_vm0, %v28_v10 }
  0x4c   :  { %559 = vmatmul.msk.f32.gmra.mxu3 %vm57_vm0, %v44_v49 }
  0x4d   :  { %544 = vmatmul.msk.f32.gmra.mxu0 %vm57_vm0, %v29_v14 }
  0x54   :  { %560 = vmatmul.msk.f32.gmra.mxu3 %vm57_vm0, %v45_v53 }
  0x55   :  { %545 = vmatmul.msk.f32.gmra.mxu0 %vm57_vm0, %v30_v19 }
  0x5c   :  { %561 = vmatmul.msk.f32.gmra.mxu3 %vm57_vm0, %v46_v57 }
  0x5d   :  { %546 = vmatmul.msk.f32.gmra.mxu0 %vm57_vm0, %v31_v24 }
  0x64   :  { %562 = vmatmul.msk.f32.gmra.mxu3 %vm57_vm0, %v47_v61 }
  0x65   :  { %547 = vmatmul.msk.f32.gmra.mxu0 %vm57_vm0, %v32_v29 }
  0x6c   :  { %563 = vmatmul.msk.f32.gmra.mxu3 %vm57_vm0, %v48_v1 }
  0x6d   :  { %548 = vmatmul.msk.f32.gmra.mxu0 %vm57_vm0, %v33_v33 }
  0x74   :  { %564 = vmatmul.msk.f32.gmra.mxu3 %vm57_vm0, %v49_v5 }
  0x75   :  { %549 = vmatmul.msk.f32.gmra.mxu0 %vm57_vm0, %v34_v35 }
  0x7c   :  { %565 = vmatmul.msk.f32.gmra.mxu3 %vm57_vm0, %v50_v9 }
  0x7d   :  { %550 = vmatmul.msk.f32.gmra.mxu0 %vm57_vm0, %v35_v37 }
  0x82   :  { %v171_v40 = vpop.f32.mrf.mxu0 }
  0x83   :  { %v172_v42 = vadd.f32 %v834_v39, %v171_v40  ;;  %v899_v40 = vld [vmem:[%s1125_s3 + $0x1] ss:$0 sm:$0xff] }
  0x84   :  { %566 = vmatmul.msk.f32.gmra.mxu3 %vm57_vm0, %v51_v13 }
  0x85   :  { %v267_v43 = vmax.f32 %v172_v42, 0.0  ;;  %551 = vmatmul.msk.f32.gmra.mxu0 %vm57_vm0, %v36_v41 }
  0x87   :  { %334 = vmatmul.f32.vlgmr.msra.gmra.mxu1 %v267_v43 }
  0x8a   :  { %v174_v45 = vpop.f32.mrf.mxu0 }
  0x8b   :  { %v175_v47 = vadd.f32 %v834_v39, %v174_v45 }
  0x8d   :  { %v268_v48 = vmax.f32 %v175_v47, 0.0  ;;  %552 = vmatmul.msk.f32.gmra.mxu0 %vm57_vm0, %v37_v46  ;;  %v906_v47 = vld [vmem:[%s1125_s3 + $0x2] ss:$0 sm:$0xff] }
  0x8f   :  { %337 = vmatmul.f32.gmra.mxu1 %v268_v48 }
  0x92   :  { %v177_v50 = vpop.f32.mrf.mxu0 }
  0x93   :  { %v178_v51 = vadd.f32 %v834_v39, %v177_v50 }
  0x95   :  { %v269_v52 = vmax.f32 %v178_v51, 0.0 }
  0x97   :  { %340 = vmatmul.f32.gmra.mxu1 %v269_v52 }
  0x9a   :  { %v180_v54 = vpop.f32.mrf.mxu0 }
  0x9b   :  { %v181_v55 = vadd.f32 %v834_v39, %v180_v54 }
  0x9d   :  { %v270_v56 = vmax.f32 %v181_v55, 0.0 }
  0x9f   :  { %343 = vmatmul.f32.gmra.mxu1 %v270_v56  ;;  %v225_v24 = vpop.f32.mrf.mxu3 }
  0xa0   :  { %v226_v56 = vadd.f32 %v834_v39, %v225_v24 }
  0xa2   :  { %v183_v58 = vpop.f32.mrf.mxu0 }
  0xa3   :  { %v184_v59 = vadd.f32 %v834_v39, %v183_v58 }
  0xa5   :  { %v271_v60 = vmax.f32 %v184_v59, 0.0 }
  0xa7   :  { %346 = vmatmul.f32.gmra.mxu1 %v271_v60  ;;  %v228_v28 = vpop.f32.mrf.mxu3  ;;  %v285_v60 = vmax.f32 %v226_v56, 0.0 }
  0xaa   :  { %v186_v62 = vpop.f32.mrf.mxu0 }
  0xab   :  { %v187_v63 = vadd.f32 %v834_v39, %v186_v62 }
  0xad   :  { %v272_v0 = vmax.f32 %v187_v63, 0.0  ;;  %v229_v63 = vadd.f32 %v834_v39, %v228_v28 }
  0xaf   :  { %349 = vmatmul.f32.gmra.mxu1 %v272_v0  ;;  %v231_v32 = vpop.f32.mrf.mxu3 }
  0xb2   :  { %v189_v2 = vpop.f32.mrf.mxu0 }
  0xb3   :  { %v190_v3 = vadd.f32 %v834_v39, %v189_v2 }
  0xb5   :  { %v273_v4 = vmax.f32 %v190_v3, 0.0  ;;  %v286_v3 = vmax.f32 %v229_v63, 0.0 }
  0xb7   :  { %352 = vmatmul.f32.gmra.mxu1 %v273_v4  ;;  %v234_v36 = vpop.f32.mrf.mxu3 }
  0xb8   :  { %v235_v13 = vadd.f32 %v834_v39, %v234_v36 }
  0xba   :  { %v192_v6 = vpop.f32.mrf.mxu0 }
  0xbb   :  { %v193_v7 = vadd.f32 %v834_v39, %v192_v6  ;;  %v232_v6 = vadd.f32 %v834_v39, %v231_v32 }
  0xbd   :  { %v274_v8 = vmax.f32 %v193_v7, 0.0 }
  0xbf   :  { %355 = vmatmul.f32.gmra.mxu1 %v274_v8  ;;  %v237_v42 = vpop.f32.mrf.mxu3 }
  0xc2   :  { %v195_v10 = vpop.f32.mrf.mxu0 }
  0xc3   :  { %v196_v11 = vadd.f32 %v834_v39, %v195_v10  ;;  %v287_v10 = vmax.f32 %v232_v6, 0.0 }
  0xc5   :  { %v275_v12 = vmax.f32 %v196_v11, 0.0 }
  0xc7   :  { %358 = vmatmul.f32.gmra.mxu1 %v275_v12  ;;  %v240_v49 = vpop.f32.mrf.mxu3 }
  0xca   :  { %v198_v14 = vpop.f32.mrf.mxu0 }
  0xcb   :  { %v199_v15 = vadd.f32 %v834_v39, %v198_v14 }
  0xcd   :  { %v276_v16 = vmax.f32 %v199_v15, 0.0 }
  0xcf   :  { %361 = vmatmul.f32.gmra.mxu1 %v276_v16  ;;  %v243_v57 = vpop.f32.mrf.mxu3 }
  0xd2   :  { %v201_v17 = vpop.f32.mrf.mxu0 }
  0xd3   :  { %v202_v18 = vadd.f32 %v834_v39, %v201_v17  ;;  %v288_v17 = vmax.f32 %v235_v13, 0.0 }
  0xd5   :  { %v277_v19 = vmax.f32 %v202_v18, 0.0 }
  0xd7   :  { %364 = vmatmul.f32.gmra.mxu1 %v277_v19  ;;  %v246_v0 = vpop.f32.mrf.mxu3 }
  0xda   :  { %v204_v20 = vpop.f32.mrf.mxu0 }
  0xdb   :  { %v205_v21 = vadd.f32 %v834_v39, %v204_v20  ;;  %v238_v20 = vadd.f32 %v834_v39, %v237_v42 }
  0xdd   :  { %v278_v22 = vmax.f32 %v205_v21, 0.0  ;;  %v289_v24 = vmax.f32 %v238_v20, 0.0 }
  0xdf   :  { %367 = vmatmul.f32.gmra.mxu1 %v278_v22  ;;  %v930_v7 = vpop.f32.mrf.mxu3 }
  0xe2   :  { %v207_v23 = vpop.f32.mrf.mxu0 }
  0xe3   :  { %v208_v25 = vadd.f32 %v834_v39, %v207_v23 }
  0xe5   :  { %v279_v26 = vmax.f32 %v208_v25, 0.0 }
  0xe7   :  { %370 = vmatmul.f32.gmra.mxu1 %v279_v26  ;;  %v939_v14 = vpop.f32.mrf.mxu3 }
  0xea   :  { %v210_v27 = vpop.f32.mrf.mxu0 }
  0xeb   :  { %v211_v29 = vadd.f32 %v834_v39, %v210_v27  ;;  %v241_v27 = vadd.f32 %v834_v39, %v240_v49 }
  0xed   :  { %v280_v30 = vmax.f32 %v211_v29, 0.0 }
  0xef   :  { %373 = vmatmul.f32.gmra.mxu1 %v280_v30  ;;  %v948_v21 = vpop.f32.mrf.mxu3 }
  0xf2   :  { %v213_v31 = vpop.f32.mrf.mxu0 }
  0xf3   :  { %v214_v33 = vadd.f32 %v834_v39, %v213_v31  ;;  %v290_v31 = vmax.f32 %v241_v27, 0.0 }
  0xf5   :  { %v281_v34 = vmax.f32 %v214_v33, 0.0 }
  0xf7   :  { %376 = vmatmul.f32.gmra.mxu1 %v281_v34  ;;  %v258_v28 = vpop.f32.mrf.mxu3  ;;  %v244_v34 = vadd.f32 %v834_v39, %v243_v57 }
  0xfa   :  { %v216_v35 = vpop.f32.mrf.mxu0 }
  0xfb   :  { %v217_v37 = vadd.f32 %v834_v39, %v216_v35 }
  0xfd   :  { %v282_v38 = vmax.f32 %v217_v37, 0.0 }
  0xff   :  { %379 = vmatmul.f32.vlgmr.msra.gmra.mxu2 %v282_v38  ;;  %v261_v35 = vpop.f32.mrf.mxu3 }
 0x100   :  { %v262_v36 = vadd.f32 %v834_v39, %v261_v35 }
 0x102   :  { %v219_v41 = vpop.f32.mrf.mxu0 }
 0x103   :  { %v220_v43 = vadd.f32 %v834_v39, %v219_v41  ;;  %v291_v41 = vmax.f32 %v244_v34, 0.0 }
 0x104   :  { %v335_v44 = vpop.f32.mrf.mxu1 }
 0x105   :  { %v283_v45 = vmax.f32 %v220_v43, 0.0  ;;  %v336_v46 = vadd.f32 %v899_v40, %v335_v44  ;;  %v297_v43 = vmax.f32 %v262_v36, 0.0 }
 0x107   :  { %604 = vtanh.f32 %v336_v46  ;;  %382 = vmatmul.f32.gmra.mxu2 %v283_v45  ;;  %424 = vmatmul.f32.vlgmr.msrb.gmra.mxu3 %v297_v43  ;;  %v247_v45 = vadd.f32 %v834_v39, %v246_v0  ;;  %v264_v46 = vpop.f32.mrf.mxu3 }
 0x10a   :  { %v222_v48 = vpop.f32.mrf.mxu0 }
 0x10b   :  { %v223_v50 = vadd.f32 %v834_v39, %v222_v48  ;;  %v265_v48 = vadd.f32 %v834_v39, %v264_v46 }
 0x10c   :  { %v338_v51 = vpop.f32.mrf.mxu1 }
 0x10d   :  { %v605_v52 = vpop.eup %604  ;;  %v284_v53 = vmax.f32 %v223_v50, 0.0  ;;  %v339_v54 = vadd.f32 %v899_v40, %v338_v51  ;;  %v292_v51 = vmax.f32 %v247_v45, 0.0 }
 0x10e   :  { %v466_v55 = vmul.f32 %v605_v52, %v906_v47 }
 0x10f   :  { %606 = vtanh.f32 %v339_v54  ;;  %385 = vmatmul.f32.gmra.mxu2 %v284_v53  ;;  %v298_v53 = vmax.f32 %v265_v48, 0.0 }
 0x110   :  { %499 = vst.msk [vmem:[%s1127_s4] sm:$0xff] %vm498_vm1, %v466_v55  ;;  %v250_v55 = vadd.f32 %v834_v39, %v930_v7 }
 0x111   :  { %427 = vmatmul.f32.gmra.mxu3 %v298_v53 }
 0x114   :  { %v341_v58 = vpop.f32.mrf.mxu1 }
 0x115   :  { %v607_v59 = vpop.eup %606  ;;  %v342_v61 = vadd.f32 %v899_v40, %v341_v58  ;;  %v293_v58 = vmax.f32 %v250_v55, 0.0 }
 0x116   :  { %v467_v62 = vmul.f32 %v607_v59, %v906_v47 }
 0x117   :  { %608 = vtanh.f32 %v342_v61  ;;  %388 = vmatmul.f32.gmra.mxu2 %v285_v60  ;;  %v253_v61 = vadd.f32 %v834_v39, %v939_v14 }
 0x118   :  { %500 = vst.msk [vmem:[%s1127_s4 + $0x8] sm:$0xff] %vm498_vm1, %v467_v62 }
 0x119   :  { %v294_v0 = vmax.f32 %v253_v61, 0.0 }
 0x11c   :  { %v344_v1 = vpop.f32.mrf.mxu1 }
 0x11d   :  { %v609_v2 = vpop.eup %608  ;;  %v345_v4 = vadd.f32 %v899_v40, %v344_v1 }
 0x11e   :  { %v468_v5 = vmul.f32 %v609_v2, %v906_v47 }
 0x11f   :  { %610 = vtanh.f32 %v345_v4  ;;  %391 = vmatmul.f32.gmra.mxu2 %v286_v3  ;;  %v256_v3 = vadd.f32 %v834_v39, %v948_v21 }
 0x120   :  { %501 = vst.msk [vmem:[%s1127_s4 + $0x10] sm:$0xff] %vm498_vm1, %v468_v5 }
 0x121   :  { %v295_v6 = vmax.f32 %v256_v3, 0.0 }
 0x124   :  { %v347_v8 = vpop.f32.mrf.mxu1 }
 0x125   :  { %v611_v9 = vpop.eup %610  ;;  %v348_v11 = vadd.f32 %v899_v40, %v347_v8 }
 0x126   :  { %v469_v12 = vmul.f32 %v611_v9, %v906_v47  ;;  %v259_v9 = vadd.f32 %v834_v39, %v258_v28 }
 0x127   :  { %612 = vtanh.f32 %v348_v11  ;;  %394 = vmatmul.f32.gmra.mxu2 %v287_v10 }
 0x128   :  { %502 = vst.msk [vmem:[%s1127_s4 + $0x18] sm:$0xff] %vm498_vm1, %v469_v12  ;;  %v296_v12 = vmax.f32 %v259_v9, 0.0 }
 0x12c   :  { %v350_v15 = vpop.f32.mrf.mxu1 }
 0x12d   :  { %v613_v16 = vpop.eup %612  ;;  %v351_v18 = vadd.f32 %v899_v40, %v350_v15 }
 0x12e   :  { %v470_v19 = vmul.f32 %v613_v16, %v906_v47 }
 0x12f   :  { %614 = vtanh.f32 %v351_v18  ;;  %397 = vmatmul.f32.gmra.mxu2 %v288_v17 }
 0x130   :  { %503 = vst.msk [vmem:[%s1127_s4 + $0x20] sm:$0xff] %vm498_vm1, %v470_v19 }
 0x134   :  { %v353_v22 = vpop.f32.mrf.mxu1 }
 0x135   :  { %v615_v23 = vpop.eup %614  ;;  %v354_v25 = vadd.f32 %v899_v40, %v353_v22 }
 0x136   :  { %v471_v26 = vmul.f32 %v615_v23, %v906_v47 }
 0x137   :  { %616 = vtanh.f32 %v354_v25  ;;  %400 = vmatmul.f32.gmra.mxu2 %v289_v24 }
 0x138   :  { %504 = vst.msk [vmem:[%s1127_s4 + $0x28] sm:$0xff] %vm498_vm1, %v471_v26 }
 0x13c   :  { %v356_v29 = vpop.f32.mrf.mxu1 }
 0x13d   :  { %v617_v30 = vpop.eup %616  ;;  %v357_v32 = vadd.f32 %v899_v40, %v356_v29 }
 0x13e   :  { %v472_v33 = vmul.f32 %v617_v30, %v906_v47 }
 0x13f   :  { %618 = vtanh.f32 %v357_v32  ;;  %403 = vmatmul.f32.gmra.mxu2 %v290_v31 }
 0x140   :  { %505 = vst.msk [vmem:[%s1127_s4 + $0x30] sm:$0xff] %vm498_vm1, %v472_v33 }
 0x144   :  { %v359_v37 = vpop.f32.mrf.mxu1 }
 0x145   :  { %v619_v38 = vpop.eup %618  ;;  %v360_v42 = vadd.f32 %v899_v40, %v359_v37 }
 0x146   :  { %v473_v44 = vmul.f32 %v619_v38, %v906_v47 }
 0x147   :  { %620 = vtanh.f32 %v360_v42  ;;  %406 = vmatmul.f32.gmra.mxu2 %v291_v41 }
 0x148   :  { %506 = vst.msk [vmem:[%s1127_s4 + $0x38] sm:$0xff] %vm498_vm1, %v473_v44 }
 0x14c   :  { %v362_v49 = vpop.f32.mrf.mxu1 }
 0x14d   :  { %v621_v50 = vpop.eup %620  ;;  %v363_v52 = vadd.f32 %v899_v40, %v362_v49 }
 0x14e   :  { %v474_v54 = vmul.f32 %v621_v50, %v906_v47 }
 0x14f   :  { %622 = vtanh.f32 %v363_v52  ;;  %409 = vmatmul.f32.gmra.mxu2 %v292_v51 }
 0x150   :  { %507 = vst.msk [vmem:[%s1127_s4 + $0x40] sm:$0xff] %vm498_vm1, %v474_v54 }
 0x154   :  { %v365_v56 = vpop.f32.mrf.mxu1 }
 0x155   :  { %v623_v57 = vpop.eup %622  ;;  %v366_v59 = vadd.f32 %v899_v40, %v365_v56 }
 0x156   :  { %v475_v60 = vmul.f32 %v623_v57, %v906_v47 }
 0x157   :  { %624 = vtanh.f32 %v366_v59  ;;  %412 = vmatmul.f32.gmra.mxu2 %v293_v58 }
 0x158   :  { %508 = vst.msk [vmem:[%s1127_s4 + $0x48] sm:$0xff] %vm498_vm1, %v475_v60 }
 0x15c   :  { %v368_v62 = vpop.f32.mrf.mxu1 }
 0x15d   :  { %v625_v63 = vpop.eup %624  ;;  %v369_v1 = vadd.f32 %v899_v40, %v368_v62 }
 0x15e   :  { %v476_v2 = vmul.f32 %v625_v63, %v906_v47 }
 0x15f   :  { %626 = vtanh.f32 %v369_v1  ;;  %415 = vmatmul.f32.gmra.mxu2 %v294_v0 }
 0x160   :  { %509 = vst.msk [vmem:[%s1127_s4 + $0x50] sm:$0xff] %vm498_vm1, %v476_v2 }
 0x164   :  { %v371_v4 = vpop.f32.mrf.mxu1 }
 0x165   :  { %v627_v5 = vpop.eup %626  ;;  %v372_v7 = vadd.f32 %v899_v40, %v371_v4 }
 0x166   :  { %v477_v8 = vmul.f32 %v627_v5, %v906_v47 }
 0x167   :  { %628 = vtanh.f32 %v372_v7  ;;  %418 = vmatmul.f32.gmra.mxu2 %v295_v6 }
 0x168   :  { %510 = vst.msk [vmem:[%s1127_s4 + $0x58] sm:$0xff] %vm498_vm1, %v477_v8 }
 0x16c   :  { %v374_v10 = vpop.f32.mrf.mxu1 }
 0x16d   :  { %v629_v11 = vpop.eup %628  ;;  %v375_v13 = vadd.f32 %v899_v40, %v374_v10 }
 0x16e   :  { %v478_v14 = vmul.f32 %v629_v11, %v906_v47 }
 0x16f   :  { %630 = vtanh.f32 %v375_v13  ;;  %421 = vmatmul.f32.gmra.mxu2 %v296_v12 }
 0x170   :  { %511 = vst.msk [vmem:[%s1127_s4 + $0x60] sm:$0xff] %vm498_vm1, %v478_v14 }
 0x174   :  { %v377_v15 = vpop.f32.mrf.mxu1 }
 0x175   :  { %v631_v16 = vpop.eup %630  ;;  %v378_v17 = vadd.f32 %v899_v40, %v377_v15 }
 0x176   :  { %v479_v39 = vmul.f32 %v631_v16, %v906_v47 }
 0x177   :  { %632 = vtanh.f32 %v378_v17 }
 0x178   :  { %512 = vst.msk [vmem:[%s1127_s4 + $0x68] sm:$0xff] %vm498_vm1, %v479_v39 }
 0x17d   :  { %v633_v18 = vpop.eup %632 }
 0x17e   :  { %v480_v19 = vmul.f32 %v633_v18, %v906_v47 }
 0x180   :  { %513 = vst.msk [vmem:[%s1127_s4 + $0x70] sm:$0xff] %vm498_vm1, %v480_v19 }
 0x182   :  { %v380_v20 = vpop.f32.mrf.mxu2 }
 0x183   :  { %v381_v21 = vadd.f32 %v899_v40, %v380_v20 }
 0x185   :  { %634 = vtanh.f32 %v381_v21 }
 0x18a   :  { %v383_v22 = vpop.f32.mrf.mxu2  ;;  %v425_v58 = vpop.f32.mrf.mxu3 }
 0x18b   :  { %v635_v23 = vpop.eup %634  ;;  %v384_v24 = vadd.f32 %v899_v40, %v383_v22  ;;  %v426_v61 = vadd.f32 %v899_v40, %v425_v58 }
 0x18c   :  { %v481_v25 = vmul.f32 %v635_v23, %v906_v47 }
 0x18d   :  { %636 = vtanh.f32 %v384_v24 }
 0x18e   :  { %514 = vst.msk [vmem:[%s1127_s4 + $0x78] sm:$0xff] %vm498_vm1, %v481_v25 }
 0x192   :  { %v386_v26 = vpop.f32.mrf.mxu2 }
 0x193   :  { %v637_v27 = vpop.eup %636  ;;  %v387_v28 = vadd.f32 %v899_v40, %v386_v26 }
 0x194   :  { %v482_v29 = vmul.f32 %v637_v27, %v906_v47  ;;  %v428_v0 = vpop.f32.mrf.mxu3 }
 0x195   :  { %638 = vtanh.f32 %v387_v28  ;;  %v429_v3 = vadd.f32 %v899_v40, %v428_v0 }
 0x196   :  { %515 = vst.msk [vmem:[%s1127_s4 + $0x80] sm:$0xff] %vm498_vm1, %v482_v29 }
 0x19a   :  { %v389_v30 = vpop.f32.mrf.mxu2 }
 0x19b   :  { %v639_v31 = vpop.eup %638  ;;  %v390_v32 = vadd.f32 %v899_v40, %v389_v30 }
 0x19c   :  { %v483_v33 = vmul.f32 %v639_v31, %v906_v47 }
 0x19d   :  { %640 = vtanh.f32 %v390_v32 }
 0x19e   :  { %516 = vst.msk [vmem:[%s1127_s4 + $0x88] sm:$0xff] %vm498_vm1, %v483_v33 }
 0x1a2   :  { %v392_v34 = vpop.f32.mrf.mxu2 }
 0x1a3   :  { %v641_v35 = vpop.eup %640  ;;  %v393_v36 = vadd.f32 %v899_v40, %v392_v34 }
 0x1a4   :  { %v484_v37 = vmul.f32 %v641_v35, %v906_v47 }
 0x1a5   :  { %642 = vtanh.f32 %v393_v36 }
 0x1a6   :  { %517 = vst.msk [vmem:[%s1127_s4 + $0x90] sm:$0xff] %vm498_vm1, %v484_v37 }
 0x1aa   :  { %v395_v38 = vpop.f32.mrf.mxu2 }
 0x1ab   :  { %v643_v41 = vpop.eup %642  ;;  %v396_v42 = vadd.f32 %v899_v40, %v395_v38 }
 0x1ac   :  { %v485_v43 = vmul.f32 %v643_v41, %v906_v47 }
 0x1ad   :  { %644 = vtanh.f32 %v396_v42 }
 0x1ae   :  { %518 = vst.msk [vmem:[%s1127_s4 + $0x98] sm:$0xff] %vm498_vm1, %v485_v43 }
 0x1b2   :  { %v398_v44 = vpop.f32.mrf.mxu2 }
 0x1b3   :  { %v645_v45 = vpop.eup %644  ;;  %v399_v46 = vadd.f32 %v899_v40, %v398_v44 }
 0x1b4   :  { %v486_v48 = vmul.f32 %v645_v45, %v906_v47 }
 0x1b5   :  { %646 = vtanh.f32 %v399_v46 }
 0x1b6   :  { %519 = vst.msk [vmem:[%s1127_s4 + $0xa0] sm:$0xff] %vm498_vm1, %v486_v48 }
 0x1ba   :  { %v401_v49 = vpop.f32.mrf.mxu2 }
 0x1bb   :  { %v647_v50 = vpop.eup %646  ;;  %v402_v51 = vadd.f32 %v899_v40, %v401_v49 }
 0x1bc   :  { %v487_v52 = vmul.f32 %v647_v50, %v906_v47 }
 0x1bd   :  { %648 = vtanh.f32 %v402_v51 }
 0x1be   :  { %520 = vst.msk [vmem:[%s1127_s4 + $0xa8] sm:$0xff] %vm498_vm1, %v487_v52 }
 0x1c2   :  { %v404_v53 = vpop.f32.mrf.mxu2 }
 0x1c3   :  { %v649_v54 = vpop.eup %648  ;;  %v405_v55 = vadd.f32 %v899_v40, %v404_v53 }
 0x1c4   :  { %v488_v56 = vmul.f32 %v649_v54, %v906_v47 }
 0x1c5   :  { %650 = vtanh.f32 %v405_v55 }
 0x1c6   :  { %521 = vst.msk [vmem:[%s1127_s4 + $0xb0] sm:$0xff] %vm498_vm1, %v488_v56 }
 0x1ca   :  { %v407_v57 = vpop.f32.mrf.mxu2 }
 0x1cb   :  { %v651_v59 = vpop.eup %650  ;;  %v408_v60 = vadd.f32 %v899_v40, %v407_v57 }
 0x1cc   :  { %v489_v62 = vmul.f32 %v651_v59, %v906_v47 }
 0x1cd   :  { %652 = vtanh.f32 %v408_v60 }
 0x1ce   :  { %522 = vst.msk [vmem:[%s1127_s4 + $0xb8] sm:$0xff] %vm498_vm1, %v489_v62  ;;  %654 = vtanh.f32 %v426_v61 }
 0x1d2   :  { %v410_v63 = vpop.f32.mrf.mxu2 }
 0x1d3   :  { %v653_v1 = vpop.eup %652  ;;  %v411_v2 = vadd.f32 %v899_v40, %v410_v63 }
 0x1d4   :  { %v655_v4 = vpop.eup %654  ;;  %v490_v5 = vmul.f32 %v653_v1, %v906_v47 }
 0x1d5   :  { %656 = vtanh.f32 %v411_v2  ;;  %v496_v6 = vmul.f32 %v655_v4, %v906_v47 }
 0x1d6   :  { %523 = vst.msk [vmem:[%s1127_s4 + $0xc0] sm:$0xff] %vm498_vm1, %v490_v5  ;;  %658 = vtanh.f32 %v429_v3 }
 0x1d7   :  { %529 = vst.msk [vmem:[%s1127_s4 + $0xf0] sm:$0xff] %vm498_vm1, %v496_v6 }
 0x1da   :  { %v413_v7 = vpop.f32.mrf.mxu2 }
 0x1db   :  { %v657_v8 = vpop.eup %656  ;;  %v414_v9 = vadd.f32 %v899_v40, %v413_v7 }
 0x1dc   :  { %v659_v10 = vpop.eup %658  ;;  %v491_v11 = vmul.f32 %v657_v8, %v906_v47 }
 0x1dd   :  { %660 = vtanh.f32 %v414_v9  ;;  %v497_v12 = vmul.f32 %v659_v10, %v906_v47 }
 0x1de   :  { %524 = vst.msk [vmem:[%s1127_s4 + $0xc8] sm:$0xff] %vm498_vm1, %v491_v11 }
 0x1df   :  { %530 = vst.msk [vmem:[%s1127_s4 + $0xf8] sm:$0xff] %vm498_vm1, %v497_v12 }
 0x1e2   :  { %v416_v13 = vpop.f32.mrf.mxu2 }
 0x1e3   :  { %v661_v14 = vpop.eup %660  ;;  %v417_v15 = vadd.f32 %v899_v40, %v416_v13 }
 0x1e4   :  { %v492_v16 = vmul.f32 %v661_v14, %v906_v47 }
 0x1e5   :  { %662 = vtanh.f32 %v417_v15 }
 0x1e6   :  { %525 = vst.msk [vmem:[%s1127_s4 + $0xd0] sm:$0xff] %vm498_vm1, %v492_v16 }
 0x1ea   :  { %v419_v17 = vpop.f32.mrf.mxu2 }
 0x1eb   :  { %v663_v39 = vpop.eup %662  ;;  %v420_v18 = vadd.f32 %v899_v40, %v419_v17 }
 0x1ec   :  { %v493_v19 = vmul.f32 %v663_v39, %v906_v47 }
 0x1ed   :  { %664 = vtanh.f32 %v420_v18 }
 0x1ee   :  { %526 = vst.msk [vmem:[%s1127_s4 + $0xd8] sm:$0xff] %vm498_vm1, %v493_v19 }
 0x1f2   :  { %v422_v20 = vpop.f32.mrf.mxu2 }
 0x1f3   :  { %v665_v21 = vpop.eup %664  ;;  %v423_v22 = vadd.f32 %v899_v40, %v422_v20 }
 0x1f4   :  { %v494_v23 = vmul.f32 %v665_v21, %v906_v47 }
 0x1f5   :  { %666 = vtanh.f32 %v423_v22 }
 0x1f6   :  { %527 = vst.msk [vmem:[%s1127_s4 + $0xe0] sm:$0xff] %vm498_vm1, %v494_v23 }
 0x1fb   :  { %v667_v24 = vpop.eup %666 }
 0x1fc   :  { %v495_v25 = vmul.f32 %v667_v24, %v906_v47 }
 0x1fe   :  { %528 = vst.msk [vmem:[%s1127_s4 + $0xe8] sm:$0xff] %vm498_vm1, %v495_v25 }

</bundles_post_ra>
